<compile_context>
chip_gen: v7x
topology: tpu7x:2x2x1
jax: 0.10.0
libtpu: 0.0.40
codegen_flags: <defaults>
</compile_context>

<pallas_src>
import functools

import jax
import jax.numpy as jnp
from jax.experimental import pallas as pl
from jax.experimental.pallas import tpu as pltpu


def _round_up(x, m):
    return ((x + m - 1) // m) * m


def _contrast_know_kernel(imgs_ref, txts_ref, w_img_ref, w_txt_ref,
                          img_out_ref, txt_out_ref):
    """One batch row-tile of the fused forward.

    img_out = tanh(imgs @ [w_img_pos | w_img_neg])  -> (tile_m, 2*D_img)
    txt_out = tanh(txts @ [w_txt_pos | w_txt_neg])  -> (tile_m, 2*D_txt)

    Pos/neg weights are pre-concatenated along the output dim, so each
    modality is a single MXU matmul (f32 accumulation) followed by an EUP
    tanh and one lane-dense 2*D-wide store.
    """
    img_y = jnp.dot(imgs_ref[...], w_img_ref[...],
                    preferred_element_type=jnp.float32)
    txt_y = jnp.dot(txts_ref[...], w_txt_ref[...],
                    preferred_element_type=jnp.float32)
    img_out_ref[...] = jnp.tanh(img_y).astype(img_out_ref.dtype)
    txt_out_ref[...] = jnp.tanh(txt_y).astype(txt_out_ref.dtype)


@functools.partial(jax.jit, static_argnames=("tile_m",))
def contrast_know_forward(imgs, texts, w_img_cat, w_txt_cat, *, tile_m=256):
    """Fused forward: both modalities, both (pos, neg) heads, one launch."""
    b, d_img = imgs.shape
    b_t, d_txt = texts.shape
    assert b == b_t, "imgs and texts must share the batch dimension"
    assert w_img_cat.shape == (d_img, 2 * d_img)
    assert w_txt_cat.shape == (d_txt, 2 * d_txt)

    # Row tile: as large as tile_m, but never larger than the (8-row rounded)
    # batch. Pad the batch to a whole number of tiles with zero rows; the
    # padded rows are sliced off after the kernel (tanh(0 @ W) = 0, harmless).
    tile = min(tile_m, _round_up(b, 8))
    b_pad = _round_up(b, tile)
    if b_pad != b:
        imgs = jnp.pad(imgs, ((0, b_pad - b), (0, 0)))
        texts = jnp.pad(texts, ((0, b_pad - b), (0, 0)))

    # Feed the MXU the same operand dtype as the weights (bf16 by default);
    # accumulation stays in f32 inside the kernel, tanh in f32.
    imgs = imgs.astype(w_img_cat.dtype)
    texts = texts.astype(w_txt_cat.dtype)

    grid = (b_pad // tile,)
    out_dtype = jnp.float32

    img_cat, txt_cat = pl.pallas_call(
        _contrast_know_kernel,
        out_shape=(
            jax.ShapeDtypeStruct((b_pad, 2 * d_img), out_dtype),
            jax.ShapeDtypeStruct((b_pad, 2 * d_txt), out_dtype),
        ),
        grid=grid,
        in_specs=[
            pl.BlockSpec((tile, d_img), lambda i: (i, 0)),          # imgs tile
            pl.BlockSpec((tile, d_txt), lambda i: (i, 0)),          # texts tile
            pl.BlockSpec((d_img, 2 * d_img), lambda i: (0, 0)),     # W_img resident
            pl.BlockSpec((d_txt, 2 * d_txt), lambda i: (0, 0)),     # W_txt resident
        ],
        out_specs=(
            pl.BlockSpec((tile, 2 * d_img), lambda i: (i, 0)),
            pl.BlockSpec((tile, 2 * d_txt), lambda i: (i, 0)),
        ),
        compiler_params=pltpu.CompilerParams(
            dimension_semantics=("parallel",),
        ),
    )(imgs, texts, w_img_cat, w_txt_cat)

    img_pos = img_cat[:b, :d_img]
    img_neg = img_cat[:b, d_img:]
    txt_pos = txt_cat[:b, :d_txt]
    txt_neg = txt_cat[:b, d_txt:]
    return img_pos, img_neg, txt_pos, txt_neg


class ContrastKnowPallas:
    """JAX/Pallas re-implementation of the PyTorch ContrastKnow module."""

    def __init__(self, txt_input_dim=128, img_input_dim=128, key=None,
                 mxu_dtype=jnp.bfloat16, tile_m=256):
        if key is None:
            key = jax.random.PRNGKey(0)
        k1, k2, k3, k4 = jax.random.split(key, 4)
        # torch.randn -> standard normal, same shapes as the nn.ParameterList.
        self.know_txt = [
            jax.random.normal(k1, (txt_input_dim, txt_input_dim), jnp.float32),
            jax.random.normal(k2, (txt_input_dim, txt_input_dim), jnp.float32),
        ]
        self.know_imgs = [
            jax.random.normal(k3, (img_input_dim, img_input_dim), jnp.float32),
            jax.random.normal(k4, (img_input_dim, img_input_dim), jnp.float32),
        ]
        self.mxu_dtype = mxu_dtype
        self.tile_m = tile_m
        # Concatenate [pos | neg] once (not per call) and cast once to the
        # MXU operand dtype. Use mxu_dtype=jnp.float32 for bit-faithful
        # PyTorch f32 semantics (slower MXU path).
        self._w_txt_cat = jnp.concatenate(self.know_txt, axis=1).astype(mxu_dtype)
        self._w_img_cat = jnp.concatenate(self.know_imgs, axis=1).astype(mxu_dtype)

    def __call__(self, imgs, texts):
        return contrast_know_forward(
            imgs, texts, self._w_img_cat, self._w_txt_cat, tile_m=self.tile_m
        )


if __name__ == "__main__":
    # Small shapes consistent with the forward: (batch, feature_dim) inputs.
    # batch=300 is deliberately not a multiple of the row tile, exercising the
    # zero-padding path and a 2-step "parallel" grid (v7x megacore-friendly).
    batch = 300
    img_dim = 128
    txt_dim = 128

    key = jax.random.PRNGKey(0)
    k_imgs, k_txts, k_params = jax.random.split(key, 3)
    imgs = jax.random.normal(k_imgs, (batch, img_dim), jnp.float32)
    texts = jax.random.normal(k_txts, (batch, txt_dim), jnp.float32)

    model = ContrastKnowPallas(
        txt_input_dim=txt_dim, img_input_dim=img_dim, key=k_params
    )

    img_pos, img_neg, txt_pos, txt_neg = model(imgs, texts)
    jax.block_until_ready((img_pos, img_neg, txt_pos, txt_neg))

    assert img_pos.shape == (batch, img_dim)
    assert img_neg.shape == (batch, img_dim)
    assert txt_pos.shape == (batch, txt_dim)
    assert txt_neg.shape == (batch, txt_dim)

    # Pure-JAX reference with the same MXU operand precision (bf16 operands,
    # f32 accumulation, f32 tanh) — matches torch.matmul + tanh semantics up
    # to the bf16 operand cast used for the MXU on v6e/v7x.
    def ref(x, w):
        return jnp.tanh(
            jnp.dot(x.astype(model.mxu_dtype), w.astype(model.mxu_dtype),
                    preferred_element_type=jnp.float32)
        )

    assert jnp.allclose(img_pos, ref(imgs, model.know_imgs[0]), atol=1e-4, rtol=1e-4)
    assert jnp.allclose(img_neg, ref(imgs, model.know_imgs[1]), atol=1e-4, rtol=1e-4)
    assert jnp.allclose(txt_pos, ref(texts, model.know_txt[0]), atol=1e-4, rtol=1e-4)
    assert jnp.allclose(txt_neg, ref(texts, model.know_txt[1]), atol=1e-4, rtol=1e-4)

    print("KERNEL_OK")
</pallas_src>

<mosaic_0001>
module attributes {stable_mosaic.version = 11 : i64} {
  func.func @_contrast_know_kernel(%arg0: i32, %arg1: memref<256x128xbf16, #tpu.memory_space<vmem>>, %arg2: memref<256x128xbf16, #tpu.memory_space<vmem>>, %arg3: memref<128x256xbf16, #tpu.memory_space<vmem>>, %arg4: memref<128x256xbf16, #tpu.memory_space<vmem>>, %arg5: memref<256x256xf32, #tpu.memory_space<vmem>>, %arg6: memref<256x256xf32, #tpu.memory_space<vmem>>) attributes {dimension_semantics = [#tpu.dimension_semantics<parallel>], iteration_bounds = array<i64: 2>, scalar_prefetch = 0 : i64, scratch_operands = 0 : i64, tpu.core_type = #tpu.core_type<tc>, window_params = [{transform_indices = @transform_0, window_bounds = array<i64: 256, 128>}, {transform_indices = @transform_1, window_bounds = array<i64: 256, 128>}, {pipeline_mode = #tpu.pipeline_mode<synchronous>, transform_indices = @transform_2, window_bounds = array<i64: 128, 256>}, {pipeline_mode = #tpu.pipeline_mode<synchronous>, transform_indices = @transform_3, window_bounds = array<i64: 128, 256>}, {transform_indices = @transform_4, window_bounds = array<i64: 256, 256>}, {transform_indices = @transform_5, window_bounds = array<i64: 256, 256>}]} {
    %c0 = arith.constant 0 : index
    %c0_0 = arith.constant 0 : index
    %0 = vector.load %arg1[%c0, %c0_0] : memref<256x128xbf16, #tpu.memory_space<vmem>>, vector<256x128xbf16>
    %c0_1 = arith.constant 0 : index
    %c0_2 = arith.constant 0 : index
    %1 = vector.load %arg3[%c0_1, %c0_2] : memref<128x256xbf16, #tpu.memory_space<vmem>>, vector<128x256xbf16>
    %cst = arith.constant dense<0.000000e+00> : vector<256x256xf32>
    %2 = tpu.matmul %0, %1, %cst {dimension_numbers = #tpu.dot_dimension_numbers<[1], [0], [0], [1], [0, 0, 1, 1], [], []>} : vector<256x128xbf16>, vector<128x256xbf16>, vector<256x256xf32> -> vector<256x256xf32>
    %c0_3 = arith.constant 0 : index
    %c0_4 = arith.constant 0 : index
    %3 = vector.load %arg2[%c0_3, %c0_4] : memref<256x128xbf16, #tpu.memory_space<vmem>>, vector<256x128xbf16>
    %c0_5 = arith.constant 0 : index
    %c0_6 = arith.constant 0 : index
    %4 = vector.load %arg4[%c0_5, %c0_6] : memref<128x256xbf16, #tpu.memory_space<vmem>>, vector<128x256xbf16>
    %cst_7 = arith.constant dense<0.000000e+00> : vector<256x256xf32>
    %5 = tpu.matmul %3, %4, %cst_7 {dimension_numbers = #tpu.dot_dimension_numbers<[1], [0], [0], [1], [0, 0, 1, 1], [], []>} : vector<256x128xbf16>, vector<128x256xbf16>, vector<256x256xf32> -> vector<256x256xf32>
    %6 = math.tanh %2 : vector<256x256xf32>
    %c0_8 = arith.constant 0 : index
    %c0_9 = arith.constant 0 : index
    %7 = vector.load %arg5[%c0_8, %c0_9] : memref<256x256xf32, #tpu.memory_space<vmem>>, vector<256x256xf32>
    tpu.vector_store %arg5[%c0_8, %c0_9], %6 {strides = array<i32>} : memref<256x256xf32, #tpu.memory_space<vmem>>, vector<256x256xf32>,
    %8 = math.tanh %5 : vector<256x256xf32>
    %c0_10 = arith.constant 0 : index
    %c0_11 = arith.constant 0 : index
    %9 = vector.load %arg6[%c0_10, %c0_11] : memref<256x256xf32, #tpu.memory_space<vmem>>, vector<256x256xf32>
    tpu.vector_store %arg6[%c0_10, %c0_11], %8 {strides = array<i32>} : memref<256x256xf32, #tpu.memory_space<vmem>>, vector<256x256xf32>,
    return
  }
  func.func @transform_0(%arg0: i32) -> (i32, i32) {
    %c0_i32 = arith.constant 0 : i32
    %c0_i32_0 = arith.constant 0 : i32
    return %arg0, %c0_i32 : i32, i32
  }
  func.func @transform_1(%arg0: i32) -> (i32, i32) {
    %c0_i32 = arith.constant 0 : i32
    %c0_i32_0 = arith.constant 0 : i32
    return %arg0, %c0_i32 : i32, i32
  }
  func.func @transform_2(%arg0: i32) -> (i32, i32) {
    %c0_i32 = arith.constant 0 : i32
    %c0_i32_0 = arith.constant 0 : i32
    %c0_i32_1 = arith.constant 0 : i32
    return %c0_i32, %c0_i32_0 : i32, i32
  }
  func.func @transform_3(%arg0: i32) -> (i32, i32) {
    %c0_i32 = arith.constant 0 : i32
    %c0_i32_0 = arith.constant 0 : i32
    %c0_i32_1 = arith.constant 0 : i32
    return %c0_i32, %c0_i32_0 : i32, i32
  }
  func.func @transform_4(%arg0: i32) -> (i32, i32) {
    %c0_i32 = arith.constant 0 : i32
    %c0_i32_0 = arith.constant 0 : i32
    return %arg0, %c0_i32 : i32, i32
  }
  func.func @transform_5(%arg0: i32) -> (i32, i32) {
    %c0_i32 = arith.constant 0 : i32
    %c0_i32_0 = arith.constant 0 : i32
    return %arg0, %c0_i32 : i32, i32
  }
}

</mosaic_0001>

<bundles_post_ra>
// kernel: contrast_know_forward.1
= control target key start
LH: loop header
LB: loop body
LE: loop exit
PB: predicated region body
PF: predicated region fallthrough
CT: control target
= control target key end

     0   :  { %s1932_s18 = smov 0   ;;  %s2255_s0 = inlined_call_operand.vmem [shape: bf16[512,128], index: 0, kind: input, shape index: {}]   ;;  %s2256_s1 = inlined_call_operand.vmem [shape: bf16[512,128], index: 1, kind: input, shape index: {}]   ;;  %s2257_s2 = inlined_call_operand.vmem [shape: bf16[128,256], index: 2, kind: input, shape index: {}]   ;;  %s2258_s3 = inlined_call_operand.vmem [shape: bf16[128,256], index: 3, kind: input, shape index: {}]   ;;  %s2259_s4 = inlined_call_operand.vmem [shape: f32[512,256], index: 4, kind: output, shape index: {0}]   ;;  %s2260_s5 = inlined_call_operand.vmem [shape: f32[512,256], index: 5, kind: output, shape index: {1}]  }
   0x1 LB: > { %s1465_s19 = sadd.s32 4294967295, %s1899_s18   ;;  %p1469_p0 = scmp.ge.s32.totalorder %s1899_s18, 1  ;;  %s1899_s18 = sphi %s1932_s18, %s16_s18  }
   0x2   : > { %p202_p1 = scmp.lt.s32.totalorder %s1899_s18, 3 }
   0x4   : > { %p203_p2 = pnand %p1469_p0, %p202_p1 }
   0x5   : > { %v1557_v0 = vld [vmem:[%s2257_s2 + $0x4] ss:$8 sps:$4 sm:$0xff] (!%p203_p2)   ;;  %v1901_v2 = vmov (!%p203_p2), 0   ;;  %v1561_v3 = vld [vmem:[%s2257_s2] ss:$8 sps:$4 sm:$0xff] (!%p203_p2)   ;;  %s1470_s13 = sshll.u32 (!%p203_p2), %s1465_s19, 5 }
   0x6   : > { %206 = sbr.rel (%p203_p2) target bundleno = 393 (0x189), region = 36  ;;  %v1559_v1 = vld [vmem:[%s2258_s3 + $0x4] ss:$8 sps:$4 sm:$0xff] (!%p203_p2)   ;;  %525 = vmatprep.mubr.bf16.mxu0 (!%p203_p2), %v1901_v2  ;;  %942 = vmatprep.mubr.bf16.mxu1 (!%p203_p2), %v1901_v2  ;;  %v1562_v4 = vld [vmem:[%s2258_s3] ss:$8 sps:$4 sm:$0xff] (!%p203_p2)   ;;  %p243_p3 = scmp.lt.s32.totalorder (!%p203_p2), %s1470_s13, 63 }
   0x7   : > { %493 = vmatprep.subr.bf16.mxu0 (!%p203_p2), %v1557_v0  ;;  %910 = vmatprep.subr.bf16.mxu1 (!%p203_p2), %v1559_v1  ;;  %v1563_v5 = vld [vmem:[%s2257_s2 + $0x14] ss:$8 sps:$4 sm:$0xff] (!%p203_p2)   ;;  %v1567_v7 = vld [vmem:[%s2257_s2 + $0x10] ss:$8 sps:$4 sm:$0xff] (!%p203_p2)   ;;  %v1569_v9 = vld [vmem:[%s2257_s2 + $0x24] ss:$8 sps:$4 sm:$0xff] (!%p203_p2)  }
   0x8   : > { %494 = vmatpush1.bf16.msra.mxu0 (!%p203_p2), %v1561_v3  ;;  %911 = vmatpush1.bf16.msra.mxu1 (!%p203_p2), %v1562_v4  ;;  %v1565_v6 = vld [vmem:[%s2258_s3 + $0x14] ss:$8 sps:$4 sm:$0xff] (!%p203_p2)   ;;  %v1568_v8 = vld [vmem:[%s2258_s3 + $0x10] ss:$8 sps:$4 sm:$0xff] (!%p203_p2)   ;;  %v1571_v10 = vld [vmem:[%s2258_s3 + $0x24] ss:$8 sps:$4 sm:$0xff] (!%p203_p2)  }
   0x9   : > { %495 = vmatprep.subr.bf16.mxu0 (!%p203_p2), %v1563_v5  ;;  %912 = vmatprep.subr.bf16.mxu1 (!%p203_p2), %v1565_v6  ;;  %v1573_v11 = vld [vmem:[%s2257_s2 + $0x20] ss:$8 sps:$4 sm:$0xff] (!%p203_p2)   ;;  %v1575_v13 = vld [vmem:[%s2257_s2 + $0x34] ss:$8 sps:$4 sm:$0xff] (!%p203_p2)   ;;  %v1579_v15 = vld [vmem:[%s2257_s2 + $0x30] ss:$8 sps:$4 sm:$0xff] (!%p203_p2)  }
   0xa   : > { %v1574_v12 = vld [vmem:[%s2258_s3 + $0x20] ss:$8 sps:$4 sm:$0xff] (!%p203_p2)   ;;  %v1577_v14 = vld [vmem:[%s2258_s3 + $0x34] ss:$8 sps:$4 sm:$0xff] (!%p203_p2)   ;;  %v1580_v16 = vld [vmem:[%s2258_s3 + $0x30] ss:$8 sps:$4 sm:$0xff] (!%p203_p2)  }
   0xb   : > { %v1581_v17 = vld [vmem:[%s2257_s2 + $0x44] ss:$8 sps:$4 sm:$0xff] (!%p203_p2)   ;;  %v1585_v19 = vld [vmem:[%s2257_s2 + $0x40] ss:$8 sps:$4 sm:$0xff] (!%p203_p2)   ;;  %v1587_v21 = vld [vmem:[%s2257_s2 + $0x54] ss:$8 sps:$4 sm:$0xff] (!%p203_p2)  }
   0xc   : > { %496 = vmatpush1.bf16.msra.mxu0 (!%p203_p2), %v1567_v7  ;;  %913 = vmatpush1.bf16.msra.mxu1 (!%p203_p2), %v1568_v8  ;;  %v1583_v18 = vld [vmem:[%s2258_s3 + $0x44] ss:$8 sps:$4 sm:$0xff] (!%p203_p2)   ;;  %v1586_v20 = vld [vmem:[%s2258_s3 + $0x40] ss:$8 sps:$4 sm:$0xff] (!%p203_p2)   ;;  %v1589_v22 = vld [vmem:[%s2258_s3 + $0x54] ss:$8 sps:$4 sm:$0xff] (!%p203_p2)  }
   0xd   : > { %497 = vmatprep.subr.bf16.mxu0 %v1569_v9  ;;  %914 = vmatprep.subr.bf16.mxu1 %v1571_v10  ;;  %s2262_s13 = smov (!%p243_p3, %s1470_s13), 63  ;;  %v1591_v23 = vld [vmem:[%s2257_s2 + $0x50] ss:$8 sps:$4 sm:$0xff]   ;;  %v1593_v25 = vld [vmem:[%s2257_s2 + $0x64] ss:$8 sps:$4 sm:$0xff]  }
   0xe   : > { %s1471_s17 = sshll.u32 %s2262_s13, 2  ;;  %v1592_v24 = vld [vmem:[%s2258_s3 + $0x50] ss:$8 sps:$4 sm:$0xff]   ;;  %v1595_v26 = vld [vmem:[%s2258_s3 + $0x64] ss:$8 sps:$4 sm:$0xff]   ;;  %s1546_s23 = sshll.u32 %s2262_s13, 4 }
   0xf   : > { %s2023_s27 = scalar_lea.vmem %s2255_s0, %s1471_s17  ;;  %s2031_s7 = scalar_lea.vmem %s2256_s1, %s1471_s17  ;;  %v1597_v27 = vld [vmem:[%s2257_s2 + $0x60] ss:$8 sps:$4 sm:$0xff]   ;;  %v1599_v29 = vld [vmem:[%s2257_s2 + $0x74] ss:$8 sps:$4 sm:$0xff]   ;;  %v1603_v31 = vld [vmem:[%s2257_s2 + $0x70] ss:$8 sps:$4 sm:$0xff]  }
  0x10   : > { %498 = vmatpush1.bf16.msra.mxu0 %v1573_v11  ;;  %915 = vmatpush1.bf16.msra.mxu1 %v1574_v12  ;;  %v1598_v28 = vld [vmem:[%s2258_s3 + $0x60] ss:$8 sps:$4 sm:$0xff]   ;;  %v1601_v30 = vld [vmem:[%s2258_s3 + $0x74] ss:$8 sps:$4 sm:$0xff]   ;;  %v1604_v32 = vld [vmem:[%s2258_s3 + $0x70] ss:$8 sps:$4 sm:$0xff]   ;;  %s2117_s25 = scalar_lea.vmem %s2259_s4, %s1546_s23  ;;  %s2122_s28 = scalar_lea.vmem %s2260_s5, %s1546_s23 }
  0x11   : > { %499 = vmatprep.subr.bf16.mxu0 %v1575_v13  ;;  %916 = vmatprep.subr.bf16.mxu1 %v1577_v14  ;;  %v1605_v33 = vld [vmem:[%s2023_s27] sm:$0xff]   ;;  %v1607_v35 = vld [vmem:[%s2023_s27 + $0x8] sm:$0xff]   ;;  %v1609_v37 = vld [vmem:[%s2023_s27 + $0x10] sm:$0xff]  }
  0x12   : > { %v1606_v34 = vld [vmem:[%s2031_s7] sm:$0xff]   ;;  %v1608_v36 = vld [vmem:[%s2031_s7 + $0x8] sm:$0xff]   ;;  %v1610_v38 = vld [vmem:[%s2031_s7 + $0x10] sm:$0xff]  }
  0x13   : > { %v1611_v39 = vld [vmem:[%s2023_s27 + $0x18] sm:$0xff]   ;;  %v1613_v41 = vld [vmem:[%s2023_s27 + $0x20] sm:$0xff]   ;;  %v1615_v43 = vld [vmem:[%s2023_s27 + $0x28] sm:$0xff]  }
  0x14   : > { %500 = vmatpush1.bf16.msra.mxu0 %v1579_v15  ;;  %917 = vmatpush1.bf16.msra.mxu1 %v1580_v16  ;;  %v1612_v40 = vld [vmem:[%s2031_s7 + $0x18] sm:$0xff]   ;;  %v1614_v42 = vld [vmem:[%s2031_s7 + $0x20] sm:$0xff]   ;;  %v1616_v44 = vld [vmem:[%s2031_s7 + $0x28] sm:$0xff]  }
  0x15   : > { %501 = vmatprep.subr.bf16.mxu0 %v1581_v17  ;;  %918 = vmatprep.subr.bf16.mxu1 %v1583_v18  ;;  %v1617_v45 = vld [vmem:[%s2023_s27 + $0x30] sm:$0xff]   ;;  %v1619_v47 = vld [vmem:[%s2023_s27 + $0x38] sm:$0xff]   ;;  %v1621_v49 = vld [vmem:[%s2023_s27 + $0x40] sm:$0xff]  }
  0x16   : > { %v1618_v46 = vld [vmem:[%s2031_s7 + $0x30] sm:$0xff]   ;;  %v1620_v48 = vld [vmem:[%s2031_s7 + $0x38] sm:$0xff]   ;;  %v1622_v50 = vld [vmem:[%s2031_s7 + $0x40] sm:$0xff]  }
  0x17   : > { %v1623_v51 = vld [vmem:[%s2023_s27 + $0x48] sm:$0xff]   ;;  %v1625_v53 = vld [vmem:[%s2023_s27 + $0x50] sm:$0xff]   ;;  %v1627_v55 = vld [vmem:[%s2023_s27 + $0x58] sm:$0xff]  }
  0x18   : > { %502 = vmatpush1.bf16.msra.mxu0 %v1585_v19  ;;  %919 = vmatpush1.bf16.msra.mxu1 %v1586_v20  ;;  %v1624_v52 = vld [vmem:[%s2031_s7 + $0x48] sm:$0xff]   ;;  %v1626_v54 = vld [vmem:[%s2031_s7 + $0x50] sm:$0xff]   ;;  %v1628_v56 = vld [vmem:[%s2031_s7 + $0x58] sm:$0xff]  }
  0x19   : > { %503 = vmatprep.subr.bf16.mxu0 %v1587_v21  ;;  %920 = vmatprep.subr.bf16.mxu1 %v1589_v22  ;;  %v1629_v57 = vld [vmem:[%s2023_s27 + $0x60] sm:$0xff]   ;;  %v1631_v59 = vld [vmem:[%s2023_s27 + $0x68] sm:$0xff]   ;;  %v1633_v61 = vld [vmem:[%s2023_s27 + $0x70] sm:$0xff]  }
  0x1a   : > { %v1630_v58 = vld [vmem:[%s2031_s7 + $0x60] sm:$0xff]   ;;  %v1632_v60 = vld [vmem:[%s2031_s7 + $0x68] sm:$0xff]   ;;  %v1634_v62 = vld [vmem:[%s2031_s7 + $0x70] sm:$0xff]  }
  0x1b   : > { %v1635_v63 = vld [vmem:[%s2023_s27 + $0x78] sm:$0xff]  }
  0x1c   : > { %504 = vmatpush1.bf16.msra.mxu0 %v1591_v23  ;;  %921 = vmatpush1.bf16.msra.mxu1 %v1592_v24  ;;  %v1636_v0 = vld [vmem:[%s2031_s7 + $0x78] sm:$0xff]  }
  0x1d   : > { %505 = vmatprep.subr.bf16.mxu0 %v1593_v25  ;;  %922 = vmatprep.subr.bf16.mxu1 %v1595_v26 }
  0x20   : > { %506 = vmatpush1.bf16.msra.mxu0 %v1597_v27  ;;  %923 = vmatpush1.bf16.msra.mxu1 %v1598_v28 }
  0x21   : > { %507 = vmatprep.subr.bf16.mxu0 %v1599_v29  ;;  %924 = vmatprep.subr.bf16.mxu1 %v1601_v30 }
  0x24   : > { %508 = vmatpush1.bf16.msra.mxu0 %v1603_v31  ;;  %925 = vmatpush1.bf16.msra.mxu1 %v1604_v32 }
  0x27   : > { %526 = vmatmul.mubr.bf16.vlgmr.msra.gmra.mrb[0].mxu0 %v1605_v33  ;;  %943 = vmatmul.mubr.bf16.vlgmr.msra.gmra.mrb[0].mxu1 %v1606_v34 }
  0x28   : > { %535 = vmatprep.mubr.bf16.mxu0 %v1901_v2  ;;  %952 = vmatprep.mubr.bf16.mxu1 %v1901_v2 }
  0x2f   : > { %536 = vmatmul.mubr.bf16.gmra.mrb[4].mxu0 %v1607_v35  ;;  %953 = vmatmul.mubr.bf16.gmra.mrb[4].mxu1 %v1608_v36 }
  0x30   : > { %545 = vmatprep.mubr.bf16.mxu0 %v1901_v2  ;;  %962 = vmatprep.mubr.bf16.mxu1 %v1901_v2 }
  0x37   : > { %546 = vmatmul.mubr.bf16.gmra.mrb[8].mxu0 %v1609_v37  ;;  %963 = vmatmul.mubr.bf16.gmra.mrb[8].mxu1 %v1610_v38 }
  0x38   : > { %555 = vmatprep.mubr.bf16.mxu0 %v1901_v2  ;;  %972 = vmatprep.mubr.bf16.mxu1 %v1901_v2 }
  0x3f   : > { %556 = vmatmul.mubr.bf16.gmra.mrb[12].mxu0 %v1611_v39  ;;  %973 = vmatmul.mubr.bf16.gmra.mrb[12].mxu1 %v1612_v40 }
  0x40   : > { %565 = vmatprep.mubr.bf16.mxu0 %v1901_v2  ;;  %982 = vmatprep.mubr.bf16.mxu1 %v1901_v2 }
  0x47   : > { %566 = vmatmul.mubr.bf16.gmra.mrb[16].mxu0 %v1613_v41  ;;  %983 = vmatmul.mubr.bf16.gmra.mrb[16].mxu1 %v1614_v42 }
  0x48   : > { %575 = vmatprep.mubr.bf16.mxu0 %v1901_v2  ;;  %992 = vmatprep.mubr.bf16.mxu1 %v1901_v2 }
  0x4f   : > { %576 = vmatmul.mubr.bf16.gmra.mrb[20].mxu0 %v1615_v43  ;;  %993 = vmatmul.mubr.bf16.gmra.mrb[20].mxu1 %v1616_v44 }
  0x50   : > { %585 = vmatprep.mubr.bf16.mxu0 %v1901_v2  ;;  %1002 = vmatprep.mubr.bf16.mxu1 %v1901_v2 }
  0x57   : > { %586 = vmatmul.mubr.bf16.gmra.mrb[24].mxu0 %v1617_v45  ;;  %1003 = vmatmul.mubr.bf16.gmra.mrb[24].mxu1 %v1618_v46 }
  0x58   : > { %595 = vmatprep.mubr.bf16.mxu0 %v1901_v2  ;;  %1012 = vmatprep.mubr.bf16.mxu1 %v1901_v2 }
  0x5f   : > { %596 = vmatmul.mubr.bf16.gmra.mrb[28].mxu0 %v1619_v47  ;;  %1013 = vmatmul.mubr.bf16.gmra.mrb[28].mxu1 %v1620_v48 }
  0x60   : > { %605 = vmatprep.mubr.bf16.mxu0 %v1901_v2  ;;  %1022 = vmatprep.mubr.bf16.mxu1 %v1901_v2 }
  0x67   : > { %606 = vmatmul.mubr.bf16.gmra.mrb[32].mxu0 %v1621_v49  ;;  %1023 = vmatmul.mubr.bf16.gmra.mrb[32].mxu1 %v1622_v50 }
  0x68   : > { %615 = vmatprep.mubr.bf16.mxu0 %v1901_v2  ;;  %1032 = vmatprep.mubr.bf16.mxu1 %v1901_v2 }
  0x6f   : > { %616 = vmatmul.mubr.bf16.gmra.mrb[36].mxu0 %v1623_v51  ;;  %1033 = vmatmul.mubr.bf16.gmra.mrb[36].mxu1 %v1624_v52 }
  0x70   : > { %625 = vmatprep.mubr.bf16.mxu0 %v1901_v2  ;;  %1042 = vmatprep.mubr.bf16.mxu1 %v1901_v2 }
  0x77   : > { %626 = vmatmul.mubr.bf16.gmra.mrb[40].mxu0 %v1625_v53  ;;  %1043 = vmatmul.mubr.bf16.gmra.mrb[40].mxu1 %v1626_v54 }
  0x78   : > { %635 = vmatprep.mubr.bf16.mxu0 %v1901_v2  ;;  %1052 = vmatprep.mubr.bf16.mxu1 %v1901_v2 }
  0x7f   : > { %636 = vmatmul.mubr.bf16.gmra.mrb[44].mxu0 %v1627_v55  ;;  %1053 = vmatmul.mubr.bf16.gmra.mrb[44].mxu1 %v1628_v56 }
  0x80   : > { %645 = vmatprep.mubr.bf16.mxu0 %v1901_v2  ;;  %1062 = vmatprep.mubr.bf16.mxu1 %v1901_v2 }
  0x87   : > { %646 = vmatmul.mubr.bf16.gmra.mrb[48].mxu0 %v1629_v57  ;;  %1063 = vmatmul.mubr.bf16.gmra.mrb[48].mxu1 %v1630_v58 }
  0x88   : > { %655 = vmatprep.mubr.bf16.mxu0 %v1901_v2  ;;  %1072 = vmatprep.mubr.bf16.mxu1 %v1901_v2 }
  0x8f   : > { %656 = vmatmul.mubr.bf16.gmra.mrb[52].mxu0 %v1631_v59  ;;  %1073 = vmatmul.mubr.bf16.gmra.mrb[52].mxu1 %v1632_v60 }
  0x90   : > { %665 = vmatprep.mubr.bf16.mxu0 %v1901_v2  ;;  %1082 = vmatprep.mubr.bf16.mxu1 %v1901_v2 }
  0x97   : > { %666 = vmatmul.mubr.bf16.gmra.mrb[56].mxu0 %v1633_v61  ;;  %1083 = vmatmul.mubr.bf16.gmra.mrb[56].mxu1 %v1634_v62 }
  0x98   : > { %675 = vmatprep.mubr.bf16.mxu0 %v1901_v2  ;;  %1092 = vmatprep.mubr.bf16.mxu1 %v1901_v2 }
  0x9f   : > { %676 = vmatmul.mubr.bf16.gmra.mrb[60].mxu0 %v1635_v63  ;;  %1093 = vmatmul.mubr.bf16.gmra.mrb[60].mxu1 %v1636_v0 }
  0xfa   : > { %v527_v1 = vpop.f32.mrb[0].mxu0  ;;  %v944_v3 = vpop.f32.mrb[0].mxu1 }
  0xfb   : > { %1637 = vtanh.f32 %v527_v1  ;;  %v529_v4 = vpop.f32.mrb[1].mxu0  ;;  %v946_v5 = vpop.f32.mrb[1].mxu1 }
  0xfc   : > { %1639 = vtanh.f32 %v944_v3  ;;  %v531_v6 = vpop.f32.mrb[2].mxu0  ;;  %v948_v7 = vpop.f32.mrb[2].mxu1 }
  0xfd   : > { %1641 = vtanh.f32 %v529_v4  ;;  %v533_v8 = vpop.f32.mrb[3].mxu0  ;;  %v950_v9 = vpop.f32.mrb[3].mxu1 }
  0xfe   : > { %1643 = vtanh.f32 %v946_v5 }
  0xff   : > { %1645 = vtanh.f32 %v531_v6 }
 0x100   : > { %1647 = vtanh.f32 %v948_v7 }
 0x101   : > { %1649 = vtanh.f32 %v533_v8 }
 0x102   : > { %1651 = vtanh.f32 %v950_v9  ;;  %v537_v2 = vpop.f32.mrb[4].mxu0  ;;  %v954_v10 = vpop.f32.mrb[4].mxu1 }
 0x103   : > { %1653 = vtanh.f32 %v537_v2  ;;  %v539_v11 = vpop.f32.mrb[5].mxu0  ;;  %v956_v12 = vpop.f32.mrb[5].mxu1 }
 0x104   : > { %1655 = vtanh.f32 %v954_v10  ;;  %v541_v13 = vpop.f32.mrb[6].mxu0  ;;  %v958_v14 = vpop.f32.mrb[6].mxu1 }
 0x105   : > { %v1638_v15 = vpop.eup %1637  ;;  %1657 = vtanh.f32 %v539_v11  ;;  %v543_v16 = vpop.f32.mrb[7].mxu0 }
 0x106   : > { %v960_v17 = vpop.f32.mrb[7].mxu1  ;;  %v1640_v18 = vpop.eup %1639  ;;  %1167 = vst [vmem:[%s2117_s25] sm:$0xff] %v1638_v15  ;;  %1659 = vtanh.f32 %v956_v12 }
 0x107   : > { %v1642_v19 = vpop.eup %1641  ;;  %1295 = vst [vmem:[%s2122_s28] sm:$0xff] %v1640_v18  ;;  %1661 = vtanh.f32 %v541_v13 }
 0x108   : > { %v1644_v20 = vpop.eup %1643  ;;  %1168 = vst [vmem:[%s2117_s25 + $0x8] sm:$0xff] %v1642_v19  ;;  %1663 = vtanh.f32 %v958_v14 }
 0x109   : > { %v1646_v21 = vpop.eup %1645  ;;  %1296 = vst [vmem:[%s2122_s28 + $0x8] sm:$0xff] %v1644_v20  ;;  %1665 = vtanh.f32 %v543_v16 }
 0x10a   : > { %v1648_v22 = vpop.eup %1647  ;;  %1169 = vst [vmem:[%s2117_s25 + $0x10] sm:$0xff] %v1646_v21  ;;  %1667 = vtanh.f32 %v960_v17  ;;  %v547_v23 = vpop.f32.mrb[8].mxu0 }
 0x10b   : > { %v964_v24 = vpop.f32.mrb[8].mxu1  ;;  %v1650_v25 = vpop.eup %1649  ;;  %1297 = vst [vmem:[%s2122_s28 + $0x10] sm:$0xff] %v1648_v22  ;;  %1669 = vtanh.f32 %v547_v23 }
 0x10c   : > { %v549_v26 = vpop.f32.mrb[9].mxu0  ;;  %v966_v27 = vpop.f32.mrb[9].mxu1  ;;  %1170 = vst [vmem:[%s2117_s25 + $0x18] sm:$0xff] %v1650_v25  ;;  %1671 = vtanh.f32 %v964_v24 }
 0x10d   : > { %v1652_v28 = vpop.eup %1651  ;;  %v551_v29 = vpop.f32.mrb[10].mxu0  ;;  %1673 = vtanh.f32 %v549_v26 }
 0x10e   : > { %v968_v30 = vpop.f32.mrb[10].mxu1  ;;  %v1654_v31 = vpop.eup %1653  ;;  %1298 = vst [vmem:[%s2122_s28 + $0x18] sm:$0xff] %v1652_v28  ;;  %1675 = vtanh.f32 %v966_v27 }
 0x10f   : > { %v553_v32 = vpop.f32.mrb[11].mxu0  ;;  %v970_v33 = vpop.f32.mrb[11].mxu1  ;;  %1171 = vst [vmem:[%s2117_s25 + $0x20] sm:$0xff] %v1654_v31  ;;  %1677 = vtanh.f32 %v551_v29 }
 0x110   : > { %v1656_v34 = vpop.eup %1655  ;;  %1679 = vtanh.f32 %v968_v30 }
 0x111   : > { %v1658_v35 = vpop.eup %1657  ;;  %1299 = vst [vmem:[%s2122_s28 + $0x20] sm:$0xff] %v1656_v34  ;;  %1681 = vtanh.f32 %v553_v32 }
 0x112   : > { %v1660_v36 = vpop.eup %1659  ;;  %1172 = vst [vmem:[%s2117_s25 + $0x28] sm:$0xff] %v1658_v35  ;;  %1683 = vtanh.f32 %v970_v33  ;;  %v557_v39 = vpop.f32.mrb[12].mxu0 }
 0x113   : > { %v1662_v37 = vpop.eup %1661  ;;  %1300 = vst [vmem:[%s2122_s28 + $0x28] sm:$0xff] %v1660_v36  ;;  %v974_v40 = vpop.f32.mrb[12].mxu1  ;;  %1685 = vtanh.f32 %v557_v39 }
 0x114   : > { %v1664_v38 = vpop.eup %1663  ;;  %1173 = vst [vmem:[%s2117_s25 + $0x30] sm:$0xff] %v1662_v37  ;;  %v559_v42 = vpop.f32.mrb[13].mxu0  ;;  %1687 = vtanh.f32 %v974_v40 }
 0x115   : > { %v1666_v41 = vpop.eup %1665  ;;  %1301 = vst [vmem:[%s2122_s28 + $0x30] sm:$0xff] %v1664_v38  ;;  %v976_v43 = vpop.f32.mrb[13].mxu1  ;;  %1689 = vtanh.f32 %v559_v42 }
 0x116   : > { %v1668_v44 = vpop.eup %1667  ;;  %1174 = vst [vmem:[%s2117_s25 + $0x38] sm:$0xff] %v1666_v41  ;;  %v561_v45 = vpop.f32.mrb[14].mxu0  ;;  %1691 = vtanh.f32 %v976_v43 }
 0x117   : > { %v978_v46 = vpop.f32.mrb[14].mxu1  ;;  %v1670_v47 = vpop.eup %1669  ;;  %1302 = vst [vmem:[%s2122_s28 + $0x38] sm:$0xff] %v1668_v44  ;;  %1693 = vtanh.f32 %v561_v45 }
 0x118   : > { %v563_v48 = vpop.f32.mrb[15].mxu0  ;;  %v980_v49 = vpop.f32.mrb[15].mxu1  ;;  %1175 = vst [vmem:[%s2117_s25 + $0x40] sm:$0xff] %v1670_v47  ;;  %1695 = vtanh.f32 %v978_v46 }
 0x119   : > { %v1672_v50 = vpop.eup %1671  ;;  %1697 = vtanh.f32 %v563_v48 }
 0x11a   : > { %v1674_v51 = vpop.eup %1673  ;;  %1303 = vst [vmem:[%s2122_s28 + $0x40] sm:$0xff] %v1672_v50  ;;  %1699 = vtanh.f32 %v980_v49  ;;  %v567_v55 = vpop.f32.mrb[16].mxu0 }
 0x11b   : > { %v1676_v52 = vpop.eup %1675  ;;  %1176 = vst [vmem:[%s2117_s25 + $0x48] sm:$0xff] %v1674_v51  ;;  %v984_v56 = vpop.f32.mrb[16].mxu1  ;;  %1701 = vtanh.f32 %v567_v55 }
 0x11c   : > { %v1678_v53 = vpop.eup %1677  ;;  %1304 = vst [vmem:[%s2122_s28 + $0x48] sm:$0xff] %v1676_v52  ;;  %v569_v58 = vpop.f32.mrb[17].mxu0  ;;  %1703 = vtanh.f32 %v984_v56 }
 0x11d   : > { %v1680_v54 = vpop.eup %1679  ;;  %1177 = vst [vmem:[%s2117_s25 + $0x50] sm:$0xff] %v1678_v53  ;;  %v986_v59 = vpop.f32.mrb[17].mxu1  ;;  %1705 = vtanh.f32 %v569_v58 }
 0x11e   : > { %v1682_v57 = vpop.eup %1681  ;;  %1305 = vst [vmem:[%s2122_s28 + $0x50] sm:$0xff] %v1680_v54  ;;  %v571_v61 = vpop.f32.mrb[18].mxu0  ;;  %1707 = vtanh.f32 %v986_v59 }
 0x11f   : > { %v1684_v60 = vpop.eup %1683  ;;  %1178 = vst [vmem:[%s2117_s25 + $0x58] sm:$0xff] %v1682_v57  ;;  %v988_v62 = vpop.f32.mrb[18].mxu1  ;;  %1709 = vtanh.f32 %v571_v61 }
 0x120   : > { %v1686_v63 = vpop.eup %1685  ;;  %1306 = vst [vmem:[%s2122_s28 + $0x58] sm:$0xff] %v1684_v60  ;;  %v573_v0 = vpop.f32.mrb[19].mxu0  ;;  %1711 = vtanh.f32 %v988_v62 }
 0x121   : > { %v990_v1 = vpop.f32.mrb[19].mxu1  ;;  %v1688_v3 = vpop.eup %1687  ;;  %1179 = vst [vmem:[%s2117_s25 + $0x60] sm:$0xff] %v1686_v63  ;;  %1713 = vtanh.f32 %v573_v0 }
 0x122   : > { %v1690_v4 = vpop.eup %1689  ;;  %1307 = vst [vmem:[%s2122_s28 + $0x60] sm:$0xff] %v1688_v3  ;;  %1715 = vtanh.f32 %v990_v1  ;;  %v577_v8 = vpop.f32.mrb[20].mxu0 }
 0x123   : > { %v1692_v5 = vpop.eup %1691  ;;  %1180 = vst [vmem:[%s2117_s25 + $0x68] sm:$0xff] %v1690_v4  ;;  %v994_v9 = vpop.f32.mrb[20].mxu1  ;;  %1717 = vtanh.f32 %v577_v8 }
 0x124   : > { %v1694_v6 = vpop.eup %1693  ;;  %1308 = vst [vmem:[%s2122_s28 + $0x68] sm:$0xff] %v1692_v5  ;;  %v579_v10 = vpop.f32.mrb[21].mxu0  ;;  %1719 = vtanh.f32 %v994_v9 }
 0x125   : > { %v1696_v7 = vpop.eup %1695  ;;  %1181 = vst [vmem:[%s2117_s25 + $0x70] sm:$0xff] %v1694_v6  ;;  %v996_v11 = vpop.f32.mrb[21].mxu1  ;;  %1721 = vtanh.f32 %v579_v10 }
 0x126   : > { %v1698_v2 = vpop.eup %1697  ;;  %1309 = vst [vmem:[%s2122_s28 + $0x70] sm:$0xff] %v1696_v7  ;;  %v581_v13 = vpop.f32.mrb[22].mxu0  ;;  %1723 = vtanh.f32 %v996_v11 }
 0x127   : > { %v1700_v12 = vpop.eup %1699  ;;  %1182 = vst [vmem:[%s2117_s25 + $0x78] sm:$0xff] %v1698_v2  ;;  %v998_v14 = vpop.f32.mrb[22].mxu1  ;;  %1725 = vtanh.f32 %v581_v13 }
 0x128   : > { %v1702_v15 = vpop.eup %1701  ;;  %1310 = vst [vmem:[%s2122_s28 + $0x78] sm:$0xff] %v1700_v12  ;;  %v583_v16 = vpop.f32.mrb[23].mxu0  ;;  %1727 = vtanh.f32 %v998_v14 }
 0x129   : > { %v1000_v17 = vpop.f32.mrb[23].mxu1  ;;  %v1704_v18 = vpop.eup %1703  ;;  %1183 = vst [vmem:[%s2117_s25 + $0x80] sm:$0xff] %v1702_v15  ;;  %1729 = vtanh.f32 %v583_v16 }
 0x12a   : > { %v1706_v19 = vpop.eup %1705  ;;  %1311 = vst [vmem:[%s2122_s28 + $0x80] sm:$0xff] %v1704_v18  ;;  %1731 = vtanh.f32 %v1000_v17  ;;  %v587_v23 = vpop.f32.mrb[24].mxu0 }
 0x12b   : > { %v1708_v20 = vpop.eup %1707  ;;  %1184 = vst [vmem:[%s2117_s25 + $0x88] sm:$0xff] %v1706_v19  ;;  %v1004_v24 = vpop.f32.mrb[24].mxu1  ;;  %1733 = vtanh.f32 %v587_v23 }
 0x12c   : > { %v1710_v21 = vpop.eup %1709  ;;  %1312 = vst [vmem:[%s2122_s28 + $0x88] sm:$0xff] %v1708_v20  ;;  %v589_v26 = vpop.f32.mrb[25].mxu0  ;;  %1735 = vtanh.f32 %v1004_v24 }
 0x12d   : > { %v1712_v22 = vpop.eup %1711  ;;  %1185 = vst [vmem:[%s2117_s25 + $0x90] sm:$0xff] %v1710_v21  ;;  %v1006_v27 = vpop.f32.mrb[25].mxu1  ;;  %1737 = vtanh.f32 %v589_v26 }
 0x12e   : > { %v1714_v25 = vpop.eup %1713  ;;  %1313 = vst [vmem:[%s2122_s28 + $0x90] sm:$0xff] %v1712_v22  ;;  %v591_v29 = vpop.f32.mrb[26].mxu0  ;;  %1739 = vtanh.f32 %v1006_v27 }
 0x12f   : > { %v1716_v28 = vpop.eup %1715  ;;  %1186 = vst [vmem:[%s2117_s25 + $0x98] sm:$0xff] %v1714_v25  ;;  %v1008_v30 = vpop.f32.mrb[26].mxu1  ;;  %1741 = vtanh.f32 %v591_v29 }
 0x130   : > { %v1718_v31 = vpop.eup %1717  ;;  %1314 = vst [vmem:[%s2122_s28 + $0x98] sm:$0xff] %v1716_v28  ;;  %v593_v32 = vpop.f32.mrb[27].mxu0  ;;  %1743 = vtanh.f32 %v1008_v30 }
 0x131   : > { %v1010_v33 = vpop.f32.mrb[27].mxu1  ;;  %v1720_v34 = vpop.eup %1719  ;;  %1187 = vst [vmem:[%s2117_s25 + $0xa0] sm:$0xff] %v1718_v31  ;;  %1745 = vtanh.f32 %v593_v32 }
 0x132   : > { %v1722_v35 = vpop.eup %1721  ;;  %1315 = vst [vmem:[%s2122_s28 + $0xa0] sm:$0xff] %v1720_v34  ;;  %1747 = vtanh.f32 %v1010_v33  ;;  %v597_v39 = vpop.f32.mrb[28].mxu0 }
 0x133   : > { %v1724_v36 = vpop.eup %1723  ;;  %1188 = vst [vmem:[%s2117_s25 + $0xa8] sm:$0xff] %v1722_v35  ;;  %v1014_v40 = vpop.f32.mrb[28].mxu1  ;;  %1749 = vtanh.f32 %v597_v39 }
 0x134   : > { %v1726_v37 = vpop.eup %1725  ;;  %1316 = vst [vmem:[%s2122_s28 + $0xa8] sm:$0xff] %v1724_v36  ;;  %v599_v42 = vpop.f32.mrb[29].mxu0  ;;  %1751 = vtanh.f32 %v1014_v40 }
 0x135   : > { %v1728_v38 = vpop.eup %1727  ;;  %1189 = vst [vmem:[%s2117_s25 + $0xb0] sm:$0xff] %v1726_v37  ;;  %v1016_v43 = vpop.f32.mrb[29].mxu1  ;;  %1753 = vtanh.f32 %v599_v42 }
 0x136   : > { %v1730_v41 = vpop.eup %1729  ;;  %1317 = vst [vmem:[%s2122_s28 + $0xb0] sm:$0xff] %v1728_v38  ;;  %v601_v45 = vpop.f32.mrb[30].mxu0  ;;  %1755 = vtanh.f32 %v1016_v43 }
 0x137   : > { %v1732_v44 = vpop.eup %1731  ;;  %1190 = vst [vmem:[%s2117_s25 + $0xb8] sm:$0xff] %v1730_v41  ;;  %v1018_v46 = vpop.f32.mrb[30].mxu1  ;;  %1757 = vtanh.f32 %v601_v45 }
 0x138   : > { %v1734_v47 = vpop.eup %1733  ;;  %1318 = vst [vmem:[%s2122_s28 + $0xb8] sm:$0xff] %v1732_v44  ;;  %v603_v48 = vpop.f32.mrb[31].mxu0  ;;  %1759 = vtanh.f32 %v1018_v46 }
 0x139   : > { %v1020_v49 = vpop.f32.mrb[31].mxu1  ;;  %v1736_v50 = vpop.eup %1735  ;;  %1191 = vst [vmem:[%s2117_s25 + $0xc0] sm:$0xff] %v1734_v47  ;;  %1761 = vtanh.f32 %v603_v48 }
 0x13a   : > { %v1738_v51 = vpop.eup %1737  ;;  %1319 = vst [vmem:[%s2122_s28 + $0xc0] sm:$0xff] %v1736_v50  ;;  %1763 = vtanh.f32 %v1020_v49  ;;  %v607_v55 = vpop.f32.mrb[32].mxu0 }
 0x13b   : > { %v1740_v52 = vpop.eup %1739  ;;  %1192 = vst [vmem:[%s2117_s25 + $0xc8] sm:$0xff] %v1738_v51  ;;  %v1024_v56 = vpop.f32.mrb[32].mxu1  ;;  %1765 = vtanh.f32 %v607_v55 }
 0x13c   : > { %v1742_v53 = vpop.eup %1741  ;;  %1320 = vst [vmem:[%s2122_s28 + $0xc8] sm:$0xff] %v1740_v52  ;;  %v609_v58 = vpop.f32.mrb[33].mxu0  ;;  %1767 = vtanh.f32 %v1024_v56 }
 0x13d   : > { %v1744_v54 = vpop.eup %1743  ;;  %1193 = vst [vmem:[%s2117_s25 + $0xd0] sm:$0xff] %v1742_v53  ;;  %v1026_v59 = vpop.f32.mrb[33].mxu1  ;;  %1769 = vtanh.f32 %v609_v58 }
 0x13e   : > { %v1746_v57 = vpop.eup %1745  ;;  %1321 = vst [vmem:[%s2122_s28 + $0xd0] sm:$0xff] %v1744_v54  ;;  %v611_v61 = vpop.f32.mrb[34].mxu0  ;;  %1771 = vtanh.f32 %v1026_v59 }
 0x13f   : > { %v1748_v60 = vpop.eup %1747  ;;  %1194 = vst [vmem:[%s2117_s25 + $0xd8] sm:$0xff] %v1746_v57  ;;  %v1028_v62 = vpop.f32.mrb[34].mxu1  ;;  %1773 = vtanh.f32 %v611_v61 }
 0x140   : > { %v1750_v63 = vpop.eup %1749  ;;  %1322 = vst [vmem:[%s2122_s28 + $0xd8] sm:$0xff] %v1748_v60  ;;  %v613_v0 = vpop.f32.mrb[35].mxu0  ;;  %1775 = vtanh.f32 %v1028_v62 }
 0x141   : > { %v1030_v1 = vpop.f32.mrb[35].mxu1  ;;  %v1752_v3 = vpop.eup %1751  ;;  %1195 = vst [vmem:[%s2117_s25 + $0xe0] sm:$0xff] %v1750_v63  ;;  %1777 = vtanh.f32 %v613_v0 }
 0x142   : > { %v1754_v4 = vpop.eup %1753  ;;  %1323 = vst [vmem:[%s2122_s28 + $0xe0] sm:$0xff] %v1752_v3  ;;  %1779 = vtanh.f32 %v1030_v1  ;;  %v617_v8 = vpop.f32.mrb[36].mxu0 }
 0x143   : > { %v1756_v5 = vpop.eup %1755  ;;  %1196 = vst [vmem:[%s2117_s25 + $0xe8] sm:$0xff] %v1754_v4  ;;  %v1034_v9 = vpop.f32.mrb[36].mxu1  ;;  %1781 = vtanh.f32 %v617_v8 }
 0x144   : > { %v1758_v6 = vpop.eup %1757  ;;  %1324 = vst [vmem:[%s2122_s28 + $0xe8] sm:$0xff] %v1756_v5  ;;  %v619_v10 = vpop.f32.mrb[37].mxu0  ;;  %1783 = vtanh.f32 %v1034_v9 }
 0x145   : > { %v1760_v7 = vpop.eup %1759  ;;  %1197 = vst [vmem:[%s2117_s25 + $0xf0] sm:$0xff] %v1758_v6  ;;  %v1036_v11 = vpop.f32.mrb[37].mxu1  ;;  %1785 = vtanh.f32 %v619_v10 }
 0x146   : > { %v1762_v2 = vpop.eup %1761  ;;  %1325 = vst [vmem:[%s2122_s28 + $0xf0] sm:$0xff] %v1760_v7  ;;  %v621_v13 = vpop.f32.mrb[38].mxu0  ;;  %1787 = vtanh.f32 %v1036_v11 }
 0x147   : > { %v1764_v12 = vpop.eup %1763  ;;  %1198 = vst [vmem:[%s2117_s25 + $0xf8] sm:$0xff] %v1762_v2  ;;  %v1038_v14 = vpop.f32.mrb[38].mxu1  ;;  %1789 = vtanh.f32 %v621_v13 }
 0x148   : > { %v1766_v15 = vpop.eup %1765  ;;  %1326 = vst [vmem:[%s2122_s28 + $0xf8] sm:$0xff] %v1764_v12  ;;  %v623_v16 = vpop.f32.mrb[39].mxu0  ;;  %1791 = vtanh.f32 %v1038_v14 }
 0x149   : > { %v1040_v17 = vpop.f32.mrb[39].mxu1  ;;  %v1768_v18 = vpop.eup %1767  ;;  %1199 = vst [vmem:[%s2117_s25 + $0x100] sm:$0xff] %v1766_v15  ;;  %1793 = vtanh.f32 %v623_v16 }
 0x14a   : > { %v1770_v19 = vpop.eup %1769  ;;  %1327 = vst [vmem:[%s2122_s28 + $0x100] sm:$0xff] %v1768_v18  ;;  %1795 = vtanh.f32 %v1040_v17  ;;  %v627_v23 = vpop.f32.mrb[40].mxu0 }
 0x14b   : > { %v1772_v20 = vpop.eup %1771  ;;  %1200 = vst [vmem:[%s2117_s25 + $0x108] sm:$0xff] %v1770_v19  ;;  %v1044_v24 = vpop.f32.mrb[40].mxu1  ;;  %1797 = vtanh.f32 %v627_v23 }
 0x14c   : > { %v1774_v21 = vpop.eup %1773  ;;  %1328 = vst [vmem:[%s2122_s28 + $0x108] sm:$0xff] %v1772_v20  ;;  %v629_v26 = vpop.f32.mrb[41].mxu0  ;;  %1799 = vtanh.f32 %v1044_v24 }
 0x14d   : > { %v1776_v22 = vpop.eup %1775  ;;  %1201 = vst [vmem:[%s2117_s25 + $0x110] sm:$0xff] %v1774_v21  ;;  %v1046_v27 = vpop.f32.mrb[41].mxu1  ;;  %1801 = vtanh.f32 %v629_v26 }
 0x14e   : > { %v1778_v25 = vpop.eup %1777  ;;  %1329 = vst [vmem:[%s2122_s28 + $0x110] sm:$0xff] %v1776_v22  ;;  %v631_v29 = vpop.f32.mrb[42].mxu0  ;;  %1803 = vtanh.f32 %v1046_v27 }
 0x14f   : > { %v1780_v28 = vpop.eup %1779  ;;  %1202 = vst [vmem:[%s2117_s25 + $0x118] sm:$0xff] %v1778_v25  ;;  %v1048_v30 = vpop.f32.mrb[42].mxu1  ;;  %1805 = vtanh.f32 %v631_v29 }
 0x150   : > { %v1782_v31 = vpop.eup %1781  ;;  %1330 = vst [vmem:[%s2122_s28 + $0x118] sm:$0xff] %v1780_v28  ;;  %v633_v32 = vpop.f32.mrb[43].mxu0  ;;  %1807 = vtanh.f32 %v1048_v30 }
 0x151   : > { %v1050_v33 = vpop.f32.mrb[43].mxu1  ;;  %v1784_v34 = vpop.eup %1783  ;;  %1203 = vst [vmem:[%s2117_s25 + $0x120] sm:$0xff] %v1782_v31  ;;  %1809 = vtanh.f32 %v633_v32 }
 0x152   : > { %v1786_v35 = vpop.eup %1785  ;;  %1331 = vst [vmem:[%s2122_s28 + $0x120] sm:$0xff] %v1784_v34  ;;  %1811 = vtanh.f32 %v1050_v33  ;;  %v637_v39 = vpop.f32.mrb[44].mxu0 }
 0x153   : > { %v1788_v36 = vpop.eup %1787  ;;  %1204 = vst [vmem:[%s2117_s25 + $0x128] sm:$0xff] %v1786_v35  ;;  %v1054_v40 = vpop.f32.mrb[44].mxu1  ;;  %1813 = vtanh.f32 %v637_v39 }
 0x154   : > { %v1790_v37 = vpop.eup %1789  ;;  %1332 = vst [vmem:[%s2122_s28 + $0x128] sm:$0xff] %v1788_v36  ;;  %v639_v42 = vpop.f32.mrb[45].mxu0  ;;  %1815 = vtanh.f32 %v1054_v40 }
 0x155   : > { %v1792_v38 = vpop.eup %1791  ;;  %1205 = vst [vmem:[%s2117_s25 + $0x130] sm:$0xff] %v1790_v37  ;;  %v1056_v43 = vpop.f32.mrb[45].mxu1  ;;  %1817 = vtanh.f32 %v639_v42 }
 0x156   : > { %v1794_v41 = vpop.eup %1793  ;;  %1333 = vst [vmem:[%s2122_s28 + $0x130] sm:$0xff] %v1792_v38  ;;  %v641_v45 = vpop.f32.mrb[46].mxu0  ;;  %1819 = vtanh.f32 %v1056_v43 }
 0x157   : > { %v1796_v44 = vpop.eup %1795  ;;  %1206 = vst [vmem:[%s2117_s25 + $0x138] sm:$0xff] %v1794_v41  ;;  %v1058_v46 = vpop.f32.mrb[46].mxu1  ;;  %1821 = vtanh.f32 %v641_v45 }
 0x158   : > { %v1798_v47 = vpop.eup %1797  ;;  %1334 = vst [vmem:[%s2122_s28 + $0x138] sm:$0xff] %v1796_v44  ;;  %v643_v48 = vpop.f32.mrb[47].mxu0  ;;  %1823 = vtanh.f32 %v1058_v46 }
 0x159   : > { %v1060_v49 = vpop.f32.mrb[47].mxu1  ;;  %v1800_v50 = vpop.eup %1799  ;;  %1207 = vst [vmem:[%s2117_s25 + $0x140] sm:$0xff] %v1798_v47  ;;  %1825 = vtanh.f32 %v643_v48 }
 0x15a   : > { %v1802_v51 = vpop.eup %1801  ;;  %1335 = vst [vmem:[%s2122_s28 + $0x140] sm:$0xff] %v1800_v50  ;;  %1827 = vtanh.f32 %v1060_v49  ;;  %v647_v55 = vpop.f32.mrb[48].mxu0 }
 0x15b   : > { %v1804_v52 = vpop.eup %1803  ;;  %1208 = vst [vmem:[%s2117_s25 + $0x148] sm:$0xff] %v1802_v51  ;;  %v1064_v56 = vpop.f32.mrb[48].mxu1  ;;  %1829 = vtanh.f32 %v647_v55 }
 0x15c   : > { %v1806_v53 = vpop.eup %1805  ;;  %1336 = vst [vmem:[%s2122_s28 + $0x148] sm:$0xff] %v1804_v52  ;;  %v649_v58 = vpop.f32.mrb[49].mxu0  ;;  %1831 = vtanh.f32 %v1064_v56 }
 0x15d   : > { %v1808_v54 = vpop.eup %1807  ;;  %1209 = vst [vmem:[%s2117_s25 + $0x150] sm:$0xff] %v1806_v53  ;;  %v1066_v59 = vpop.f32.mrb[49].mxu1  ;;  %1833 = vtanh.f32 %v649_v58 }
 0x15e   : > { %v1810_v57 = vpop.eup %1809  ;;  %1337 = vst [vmem:[%s2122_s28 + $0x150] sm:$0xff] %v1808_v54  ;;  %v651_v61 = vpop.f32.mrb[50].mxu0  ;;  %1835 = vtanh.f32 %v1066_v59 }
 0x15f   : > { %v1812_v60 = vpop.eup %1811  ;;  %1210 = vst [vmem:[%s2117_s25 + $0x158] sm:$0xff] %v1810_v57  ;;  %v1068_v62 = vpop.f32.mrb[50].mxu1  ;;  %1837 = vtanh.f32 %v651_v61 }
 0x160   : > { %v1814_v63 = vpop.eup %1813  ;;  %1338 = vst [vmem:[%s2122_s28 + $0x158] sm:$0xff] %v1812_v60  ;;  %v653_v0 = vpop.f32.mrb[51].mxu0  ;;  %1839 = vtanh.f32 %v1068_v62 }
 0x161   : > { %v1070_v1 = vpop.f32.mrb[51].mxu1  ;;  %v1816_v3 = vpop.eup %1815  ;;  %1211 = vst [vmem:[%s2117_s25 + $0x160] sm:$0xff] %v1814_v63  ;;  %1841 = vtanh.f32 %v653_v0 }
 0x162   : > { %v1818_v4 = vpop.eup %1817  ;;  %1339 = vst [vmem:[%s2122_s28 + $0x160] sm:$0xff] %v1816_v3  ;;  %1843 = vtanh.f32 %v1070_v1  ;;  %v657_v8 = vpop.f32.mrb[52].mxu0 }
 0x163   : > { %v1820_v5 = vpop.eup %1819  ;;  %1212 = vst [vmem:[%s2117_s25 + $0x168] sm:$0xff] %v1818_v4  ;;  %v1074_v9 = vpop.f32.mrb[52].mxu1  ;;  %1845 = vtanh.f32 %v657_v8 }
 0x164   : > { %v1822_v6 = vpop.eup %1821  ;;  %1340 = vst [vmem:[%s2122_s28 + $0x168] sm:$0xff] %v1820_v5  ;;  %v659_v10 = vpop.f32.mrb[53].mxu0  ;;  %1847 = vtanh.f32 %v1074_v9 }
 0x165   : > { %v1824_v7 = vpop.eup %1823  ;;  %1213 = vst [vmem:[%s2117_s25 + $0x170] sm:$0xff] %v1822_v6  ;;  %v1076_v11 = vpop.f32.mrb[53].mxu1  ;;  %1849 = vtanh.f32 %v659_v10 }
 0x166   : > { %v1826_v2 = vpop.eup %1825  ;;  %1341 = vst [vmem:[%s2122_s28 + $0x170] sm:$0xff] %v1824_v7  ;;  %v661_v13 = vpop.f32.mrb[54].mxu0  ;;  %1851 = vtanh.f32 %v1076_v11 }
 0x167   : > { %v1828_v12 = vpop.eup %1827  ;;  %1214 = vst [vmem:[%s2117_s25 + $0x178] sm:$0xff] %v1826_v2  ;;  %v1078_v14 = vpop.f32.mrb[54].mxu1  ;;  %1853 = vtanh.f32 %v661_v13 }
 0x168   : > { %v1830_v15 = vpop.eup %1829  ;;  %1342 = vst [vmem:[%s2122_s28 + $0x178] sm:$0xff] %v1828_v12  ;;  %v663_v16 = vpop.f32.mrb[55].mxu0  ;;  %1855 = vtanh.f32 %v1078_v14 }
 0x169   : > { %v1080_v17 = vpop.f32.mrb[55].mxu1  ;;  %v1832_v18 = vpop.eup %1831  ;;  %1215 = vst [vmem:[%s2117_s25 + $0x180] sm:$0xff] %v1830_v15  ;;  %1857 = vtanh.f32 %v663_v16 }
 0x16a   : > { %v1834_v19 = vpop.eup %1833  ;;  %1343 = vst [vmem:[%s2122_s28 + $0x180] sm:$0xff] %v1832_v18  ;;  %1859 = vtanh.f32 %v1080_v17  ;;  %v667_v23 = vpop.f32.mrb[56].mxu0 }
 0x16b   : > { %v1836_v20 = vpop.eup %1835  ;;  %1216 = vst [vmem:[%s2117_s25 + $0x188] sm:$0xff] %v1834_v19  ;;  %v1084_v24 = vpop.f32.mrb[56].mxu1  ;;  %1861 = vtanh.f32 %v667_v23 }
 0x16c   : > { %v1838_v21 = vpop.eup %1837  ;;  %1344 = vst [vmem:[%s2122_s28 + $0x188] sm:$0xff] %v1836_v20  ;;  %v669_v26 = vpop.f32.mrb[57].mxu0  ;;  %1863 = vtanh.f32 %v1084_v24 }
 0x16d   : > { %v1840_v22 = vpop.eup %1839  ;;  %1217 = vst [vmem:[%s2117_s25 + $0x190] sm:$0xff] %v1838_v21  ;;  %v1086_v27 = vpop.f32.mrb[57].mxu1  ;;  %1865 = vtanh.f32 %v669_v26 }
 0x16e   : > { %v1842_v25 = vpop.eup %1841  ;;  %1345 = vst [vmem:[%s2122_s28 + $0x190] sm:$0xff] %v1840_v22  ;;  %v671_v29 = vpop.f32.mrb[58].mxu0  ;;  %1867 = vtanh.f32 %v1086_v27 }
 0x16f   : > { %v1844_v28 = vpop.eup %1843  ;;  %1218 = vst [vmem:[%s2117_s25 + $0x198] sm:$0xff] %v1842_v25  ;;  %v1088_v30 = vpop.f32.mrb[58].mxu1  ;;  %1869 = vtanh.f32 %v671_v29 }
 0x170   : > { %v1846_v31 = vpop.eup %1845  ;;  %1346 = vst [vmem:[%s2122_s28 + $0x198] sm:$0xff] %v1844_v28  ;;  %v673_v32 = vpop.f32.mrb[59].mxu0  ;;  %1871 = vtanh.f32 %v1088_v30 }
 0x171   : > { %v1090_v33 = vpop.f32.mrb[59].mxu1  ;;  %v1848_v34 = vpop.eup %1847  ;;  %1219 = vst [vmem:[%s2117_s25 + $0x1a0] sm:$0xff] %v1846_v31  ;;  %1873 = vtanh.f32 %v673_v32 }
 0x172   : > { %v1850_v35 = vpop.eup %1849  ;;  %1347 = vst [vmem:[%s2122_s28 + $0x1a0] sm:$0xff] %v1848_v34  ;;  %1875 = vtanh.f32 %v1090_v33  ;;  %v677_v39 = vpop.f32.mrb[60].mxu0 }
 0x173   : > { %v1852_v36 = vpop.eup %1851  ;;  %1220 = vst [vmem:[%s2117_s25 + $0x1a8] sm:$0xff] %v1850_v35  ;;  %v1094_v40 = vpop.f32.mrb[60].mxu1  ;;  %1877 = vtanh.f32 %v677_v39 }
 0x174   : > { %v1854_v37 = vpop.eup %1853  ;;  %1348 = vst [vmem:[%s2122_s28 + $0x1a8] sm:$0xff] %v1852_v36  ;;  %v679_v42 = vpop.f32.mrb[61].mxu0  ;;  %1879 = vtanh.f32 %v1094_v40 }
 0x175   : > { %v1856_v38 = vpop.eup %1855  ;;  %1221 = vst [vmem:[%s2117_s25 + $0x1b0] sm:$0xff] %v1854_v37  ;;  %v1096_v43 = vpop.f32.mrb[61].mxu1  ;;  %1881 = vtanh.f32 %v679_v42 }
 0x176   : > { %v1858_v41 = vpop.eup %1857  ;;  %1349 = vst [vmem:[%s2122_s28 + $0x1b0] sm:$0xff] %v1856_v38  ;;  %v681_v45 = vpop.f32.mrb[62].mxu0  ;;  %1883 = vtanh.f32 %v1096_v43 }
 0x177   : > { %v1860_v44 = vpop.eup %1859  ;;  %1222 = vst [vmem:[%s2117_s25 + $0x1b8] sm:$0xff] %v1858_v41  ;;  %v1098_v46 = vpop.f32.mrb[62].mxu1  ;;  %1885 = vtanh.f32 %v681_v45 }
 0x178   : > { %v1862_v47 = vpop.eup %1861  ;;  %1350 = vst [vmem:[%s2122_s28 + $0x1b8] sm:$0xff] %v1860_v44  ;;  %v683_v48 = vpop.f32.mrb[63].mxu0  ;;  %1887 = vtanh.f32 %v1098_v46 }
 0x179   : > { %v1100_v49 = vpop.f32.mrb[63].mxu1  ;;  %v1864_v50 = vpop.eup %1863  ;;  %1223 = vst [vmem:[%s2117_s25 + $0x1c0] sm:$0xff] %v1862_v47  ;;  %1889 = vtanh.f32 %v683_v48 }
 0x17a   : > { %v1866_v51 = vpop.eup %1865  ;;  %1351 = vst [vmem:[%s2122_s28 + $0x1c0] sm:$0xff] %v1864_v50  ;;  %1891 = vtanh.f32 %v1100_v49 }
 0x17b   : > { %v1868_v52 = vpop.eup %1867  ;;  %1224 = vst [vmem:[%s2117_s25 + $0x1c8] sm:$0xff] %v1866_v51 }
 0x17c   : > { %v1870_v53 = vpop.eup %1869  ;;  %1352 = vst [vmem:[%s2122_s28 + $0x1c8] sm:$0xff] %v1868_v52 }
 0x17d   : > { %v1872_v54 = vpop.eup %1871  ;;  %1225 = vst [vmem:[%s2117_s25 + $0x1d0] sm:$0xff] %v1870_v53 }
 0x17e   : > { %v1874_v55 = vpop.eup %1873  ;;  %1353 = vst [vmem:[%s2122_s28 + $0x1d0] sm:$0xff] %v1872_v54 }
 0x17f   : > { %v1876_v56 = vpop.eup %1875  ;;  %1226 = vst [vmem:[%s2117_s25 + $0x1d8] sm:$0xff] %v1874_v55 }
 0x180   : > { %v1878_v57 = vpop.eup %1877  ;;  %1354 = vst [vmem:[%s2122_s28 + $0x1d8] sm:$0xff] %v1876_v56 }
 0x181   : > { %v1880_v58 = vpop.eup %1879  ;;  %1227 = vst [vmem:[%s2117_s25 + $0x1e0] sm:$0xff] %v1878_v57 }
 0x182   : > { %v1882_v59 = vpop.eup %1881  ;;  %1355 = vst [vmem:[%s2122_s28 + $0x1e0] sm:$0xff] %v1880_v58 }
 0x183   : > { %v1884_v60 = vpop.eup %1883  ;;  %1228 = vst [vmem:[%s2117_s25 + $0x1e8] sm:$0xff] %v1882_v59 }
 0x184   : > { %v1886_v61 = vpop.eup %1885  ;;  %1356 = vst [vmem:[%s2122_s28 + $0x1e8] sm:$0xff] %v1884_v60 }
 0x185   : > { %v1888_v62 = vpop.eup %1887  ;;  %1229 = vst [vmem:[%s2117_s25 + $0x1f0] sm:$0xff] %v1886_v61 }
 0x186   : > { %v1890_v63 = vpop.eup %1889  ;;  %1357 = vst [vmem:[%s2122_s28 + $0x1f0] sm:$0xff] %v1888_v62 }
 0x187   : > { %v1892_v0 = vpop.eup %1891  ;;  %1230 = vst [vmem:[%s2117_s25 + $0x1f8] sm:$0xff] %v1890_v63 }
 0x188   : > { %1358 = vst [vmem:[%s2122_s28 + $0x1f8] sm:$0xff] %v1892_v0 }
 0x189 PF: > { %s16_s18 = sadd.s32 1, %s1899_s18  }
 0x18a   : > { %p13_p4 = scmp.ge.s32.totalorder %s16_s18, 4  }
 0x18c   :  { %15 = sbr.rel (!%p13_p4) target bundleno = 1 (0x1), region = 81 }

</bundles_post_ra>
